<compile_context>
chip_gen: v5e
topology: v5e:2x2
jax: 0.10.0
libtpu: 0.0.40
codegen_flags: <defaults>
</compile_context>

<pallas_src>
import functools

import jax
import jax.numpy as jnp
from jax.experimental import pallas as pl
from jax.experimental.pallas import tpu as pltpu


def _round_up(x, m):
    return ((x + m - 1) // m) * m


def _tensorcores_per_device():
    """Best-effort: 1 for single-TC parts (v2/v3/v5e/v6e), 2 for megacore/v7x."""
    try:
        kind = jax.devices()[0].device_kind.lower()
    except Exception:
        return 2
    single_tc = ("lite" in kind) or ("v5e" in kind) or ("v6e" in kind) \
        or ("v2" in kind) or ("v3" in kind)
    return 1 if single_tc else 2


def _pick_tile(E, tile_e, d, itemsize, two_core, sub):
    """Edge-tile size (rows per grid step)."""
    # Cap te so double-buffered src+dst stream buffers stay ~<= 8 MiB.
    cap = max(256, ((8 << 20) // (4 * d * itemsize)) // 128 * 128)
    big = min(tile_e, cap)
    if E <= 256:
        return _round_up(E, sub)            # single small tile
    if E <= big:
        if two_core:
            return _round_up(pl.cdiv(E, 2), 128)   # >=2 steps so both TCs get work
        return _round_up(E, 128)            # single-TC: one tile, no split overhead
    return big                              # large E: full-size tile (multiple of 128)


def _make_mlp_kernel(num_layers):
    """refs layout: (src_ref, dst_ref, *params, out_ref).

    params: [w0_src, w0_dst, b0, w1, b1, ..., w_last_row(1,h), b_last(1,1)]
    (final layer's weight is the transposed (1, h_in) f32 row; biases are f32).
    """

    def kernel(src_ref, dst_ref, *refs):
        out_ref = refs[-1]
        params = refs[:-1]

        if num_layers == 1:
            # single Linear(2d -> 1): pure VPU (broadcast-mul + lane reduce)
            w0s = params[0][...]                       # (1, d) f32
            w0d = params[1][...]                       # (1, d) f32
            b0 = params[2][...]                        # (1, 1) f32
            col = (
                jnp.sum(src_ref[...].astype(jnp.float32) * w0s, axis=-1, keepdims=True)
                + jnp.sum(dst_ref[...].astype(jnp.float32) * w0d, axis=-1, keepdims=True)
                + b0
            )                                          # (te, 1)
            out_ref[...] = col.T.astype(out_ref.dtype)  # lane-dense (1, te) row
            return

        # ---- layer 0: fused concat via split W0 (MXU, f32 accumulation) ----
        w0s = params[0][...]
        w0d = params[1][...]
        b0 = params[2][...]                            # f32 (1, h0)
        h = (
            jnp.dot(src_ref[...], w0s, preferred_element_type=jnp.float32)
            + jnp.dot(dst_ref[...], w0d, preferred_element_type=jnp.float32)
            + b0
        )
        h = jnp.maximum(h, 0.0)

        # ---- hidden layers 1 .. L-2 (MXU) ----
        for l in range(1, num_layers - 1):
            w = params[3 + 2 * (l - 1)][...]
            b = params[4 + 2 * (l - 1)][...]           # f32 (1, h_l)
            h = jnp.dot(h.astype(w.dtype), w, preferred_element_type=jnp.float32) + b
            h = jnp.maximum(h, 0.0)

        # ---- final scalar layer: VPU mul + lane reduce (no N=1 MXU matmul) ----
        w_last = params[-2][...]                       # f32 (1, h_last)
        b_last = params[-1][...]                       # f32 (1, 1)
        col = jnp.sum(h * w_last, axis=-1, keepdims=True) + b_last   # (te, 1)
        out_ref[...] = col.T.astype(out_ref.dtype)     # lane-dense (1, te) row

    return kernel


@functools.partial(jax.jit, static_argnames=("tile_e", "use_bf16"))
def link_weight_decoder_forward(node_embeddings, edge_index, weights, biases,
                                tile_e=2048, use_bf16=True):
    """
    node_embeddings: [N, d] float32
    edge_index:      [2, E] int32
    weights: list of [d_in, d_out] float32 (d_in of layer 0 is 2*d)
    biases:  list of [d_out] float32
    returns: [E, 1] float32 predicted edge weights
    """
    N, d = node_embeddings.shape
    E = edge_index.shape[1]
    num_layers = len(weights)

    if E == 0:
        return jnp.zeros((0, 1), jnp.float32)

    cdtype = jnp.bfloat16 if use_bf16 else jnp.float32
    f32 = jnp.float32
    itemsize = jnp.dtype(cdtype).itemsize
    sub = 16 if use_bf16 else 8                      # bf16 sublane packing minimum

    two_core = _tensorcores_per_device() >= 2
    te = _pick_tile(E, tile_e, d, itemsize, two_core, sub)
    E_pad = _round_up(E, te)
    n_tiles = E_pad // te

    # ---- pad the cheap int32 indices (NOT the float streams), then gather ----
    ei = edge_index.astype(jnp.int32)
    if E_pad != E:
        ei = jnp.pad(ei, ((0, 0), (0, E_pad - E)))   # padded edges point at node 0;
        # their outputs are garbage-but-finite and sliced away below.
    emb = node_embeddings.astype(cdtype)
    src = jnp.take(emb, ei[0], axis=0)               # [E_pad, d], already padded
    dst = jnp.take(emb, ei[1], axis=0)               # [E_pad, d]

    # ---- params: split W0, pre-cast once; final layer kept f32 as a (1,h) row ----
    if num_layers == 1:
        w0 = weights[0].astype(f32)                  # (2d, 1)
        params = [w0[:d].T, w0[d:].T, biases[0].astype(f32).reshape(1, 1)]
    else:
        w0 = weights[0].astype(cdtype)
        params = [w0[:d], w0[d:], biases[0].astype(f32).reshape(1, -1)]
        for l in range(1, num_layers - 1):
            params.append(weights[l].astype(cdtype))
            params.append(biases[l].astype(f32).reshape(1, -1))
        params.append(weights[-1].astype(f32).T)     # (1, h_last)
        params.append(biases[-1].astype(f32).reshape(1, 1))

    # ---- BlockSpecs ----
    in_specs = [
        pl.BlockSpec((te, d), lambda i: (i, 0)),     # src tile
        pl.BlockSpec((te, d), lambda i: (i, 0)),     # dst tile
    ]
    for p in params:
        in_specs.append(pl.BlockSpec(p.shape, lambda i: (0, 0)))   # resident params
    out_spec = pl.BlockSpec((1, te), lambda i: (i, 0))             # lane-dense row

    # ---- cost estimate (lets XLA overlap the gather with the custom call) ----
    dims = [weights[0].shape[0]] + [w.shape[1] for w in weights]   # [2d, h0, ..., 1]
    flops = int(2 * E_pad * sum(dims[i] * dims[i + 1] for i in range(len(dims) - 1)))
    param_bytes = int(sum(p.size * p.dtype.itemsize for p in params))
    bytes_accessed = int(2 * E_pad * d * itemsize + E_pad * 4 + param_bytes)
    cost = pl.CostEstimate(flops=flops, transcendentals=0, bytes_accessed=bytes_accessed)

    # ---- explicit VMEM budget (v5e default scoped VMEM is only 16 MiB) ----
    h_max = max([w.shape[1] for w in weights] + [d])
    need = (4 * te * d * itemsize                    # src+dst double-buffered
            + 2 * te * 4                             # output rows double-buffered
            + 2 * param_bytes                        # resident params (buffered)
            + 4 * te * h_max * 4)                    # activation headroom
    vmem_limit = int(min(max(need + (8 << 20), 32 << 20), 56 << 20))

    out = pl.pallas_call(
        _make_mlp_kernel(num_layers),
        out_shape=jax.ShapeDtypeStruct((n_tiles, te), jnp.float32),
        grid_spec=pltpu.PrefetchScalarGridSpec(
            num_scalar_prefetch=0,
            grid=(n_tiles,),
            in_specs=in_specs,
            out_specs=out_spec,
        ),
        compiler_params=pltpu.CompilerParams(
            dimension_semantics=("parallel",),
            vmem_limit_bytes=vmem_limit,
        ),
        cost_estimate=cost,
    )(src, dst, *params)

    return out.reshape(E_pad, 1)[:E]


def init_params(in_channels, layer_sizes, key):
    """Deterministic synthetic init matching nn.Linear shapes (weights stored as [d_in, d_out])."""
    weights, biases = [], []
    dims = [2 * in_channels] + list(layer_sizes) + [1]
    for i in range(len(dims) - 1):
        d_in, d_out = dims[i], dims[i + 1]
        key, kw, kb = jax.random.split(key, 3)
        bound = 1.0 / jnp.sqrt(d_in)
        weights.append(jax.random.uniform(kw, (d_in, d_out), jnp.float32, -bound, bound))
        biases.append(jax.random.uniform(kb, (d_out,), jnp.float32, -bound, bound))
    return weights, biases


def reference_forward(node_embeddings, edge_index, weights, biases):
    src = node_embeddings[edge_index[0]]
    dst = node_embeddings[edge_index[1]]
    h = jnp.concatenate([src, dst], axis=1)
    for l, (w, b) in enumerate(zip(weights, biases)):
        h = h @ w + b
        if l < len(weights) - 1:
            h = jnp.maximum(h, 0.0)
    return h


if __name__ == "__main__":
    key = jax.random.PRNGKey(0)

    # ---- test 1: tiny graph, f32 path (exact check, single tile) ----
    k_emb, k_edge, k_param, key = jax.random.split(key, 4)
    N, d = 10, 16
    E = 8
    layer_sizes = [32, 64]

    node_embeddings = jax.random.normal(k_emb, (N, d), jnp.float32)
    edge_index = jax.random.randint(k_edge, (2, E), 0, N, jnp.int32)
    weights, biases = init_params(d, layer_sizes, k_param)

    out = link_weight_decoder_forward(node_embeddings, edge_index, weights, biases,
                                      use_bf16=False)
    out = jax.block_until_ready(out)
    ref = reference_forward(node_embeddings, edge_index, weights, biases)
    assert out.shape == (E, 1), out.shape
    assert jnp.allclose(out, ref, atol=1e-4, rtol=1e-4), (out, ref)

    # ---- test 2: multi-tile path, default bf16 streaming (looser tolerance) ----
    k_emb2, k_edge2, k_param2, key = jax.random.split(key, 4)
    N2, d2, E2 = 64, 32, 300
    layer_sizes2 = [32]

    node_embeddings2 = jax.random.normal(k_emb2, (N2, d2), jnp.float32)
    edge_index2 = jax.random.randint(k_edge2, (2, E2), 0, N2, jnp.int32)
    weights2, biases2 = init_params(d2, layer_sizes2, k_param2)

    out2 = link_weight_decoder_forward(node_embeddings2, edge_index2, weights2, biases2)
    out2 = jax.block_until_ready(out2)
    ref2 = reference_forward(node_embeddings2, edge_index2, weights2, biases2)
    assert out2.shape == (E2, 1), out2.shape
    assert jnp.allclose(out2, ref2, atol=5e-2, rtol=5e-2), (out2, ref2)

    # ---- test 3: no hidden layers (pure VPU final layer), bf16 default ----
    k_emb3, k_edge3, k_param3, key = jax.random.split(key, 4)
    N3, d3, E3 = 32, 16, 50
    node_embeddings3 = jax.random.normal(k_emb3, (N3, d3), jnp.float32)
    edge_index3 = jax.random.randint(k_edge3, (2, E3), 0, N3, jnp.int32)
    weights3, biases3 = init_params(d3, [], k_param3)

    out3 = link_weight_decoder_forward(node_embeddings3, edge_index3, weights3, biases3)
    out3 = jax.block_until_ready(out3)
    ref3 = reference_forward(node_embeddings3, edge_index3, weights3, biases3)
    assert out3.shape == (E3, 1), out3.shape
    assert jnp.allclose(out3, ref3, atol=5e-2, rtol=5e-2), (out3, ref3)

    # ---- test 4: larger E exercising the big-tile (te=2048) + padded-index path ----
    k_emb4, k_edge4, k_param4, key = jax.random.split(key, 4)
    N4, d4, E4 = 256, 32, 5000
    layer_sizes4 = [32, 64]
    node_embeddings4 = jax.random.normal(k_emb4, (N4, d4), jnp.float32)
    edge_index4 = jax.random.randint(k_edge4, (2, E4), 0, N4, jnp.int32)
    weights4, biases4 = init_params(d4, layer_sizes4, k_param4)

    out4 = link_weight_decoder_forward(node_embeddings4, edge_index4, weights4, biases4)
    out4 = jax.block_until_ready(out4)
    ref4 = reference_forward(node_embeddings4, edge_index4, weights4, biases4)
    assert out4.shape == (E4, 1), out4.shape
    assert jnp.allclose(out4, ref4, atol=5e-2, rtol=5e-2), (out4, ref4)

    print("KERNEL_OK")
</pallas_src>

<mosaic_0001>
module attributes {stable_mosaic.version = 11 : i64} {
  func.func @kernel(%arg0: i32, %arg1: memref<8x16xf32, #tpu.memory_space<vmem>>, %arg2: memref<8x16xf32, #tpu.memory_space<vmem>>, %arg3: memref<16x32xf32, #tpu.memory_space<vmem>>, %arg4: memref<16x32xf32, #tpu.memory_space<vmem>>, %arg5: memref<1x32xf32, #tpu.memory_space<vmem>>, %arg6: memref<32x64xf32, #tpu.memory_space<vmem>>, %arg7: memref<1x64xf32, #tpu.memory_space<vmem>>, %arg8: memref<1x64xf32, #tpu.memory_space<vmem>>, %arg9: memref<1x1xf32, #tpu.memory_space<vmem>>, %arg10: memref<1x8xf32, #tpu.memory_space<vmem>>) attributes {dimension_semantics = [#tpu.dimension_semantics<parallel>], iteration_bounds = array<i64: 1>, scalar_prefetch = 0 : i64, scratch_operands = 0 : i64, tpu.core_type = #tpu.core_type<tc>, window_params = [{transform_indices = @transform_0, window_bounds = array<i64: 8, 16>}, {transform_indices = @transform_1, window_bounds = array<i64: 8, 16>}, {pipeline_mode = #tpu.pipeline_mode<synchronous>, transform_indices = @transform_2, window_bounds = array<i64: 16, 32>}, {pipeline_mode = #tpu.pipeline_mode<synchronous>, transform_indices = @transform_3, window_bounds = array<i64: 16, 32>}, {pipeline_mode = #tpu.pipeline_mode<synchronous>, transform_indices = @transform_4, window_bounds = array<i64: 1, 32>}, {pipeline_mode = #tpu.pipeline_mode<synchronous>, transform_indices = @transform_5, window_bounds = array<i64: 32, 64>}, {pipeline_mode = #tpu.pipeline_mode<synchronous>, transform_indices = @transform_6, window_bounds = array<i64: 1, 64>}, {pipeline_mode = #tpu.pipeline_mode<synchronous>, transform_indices = @transform_7, window_bounds = array<i64: 1, 64>}, {pipeline_mode = #tpu.pipeline_mode<synchronous>, transform_indices = @transform_8, window_bounds = array<i64: 1, 1>}, {transform_indices = @transform_9, window_bounds = array<i64: 1, 8>}]} {
    %c0 = arith.constant 0 : index
    %c0_0 = arith.constant 0 : index
    %0 = vector.load %arg3[%c0, %c0_0] : memref<16x32xf32, #tpu.memory_space<vmem>>, vector<16x32xf32>
    %c0_1 = arith.constant 0 : index
    %c0_2 = arith.constant 0 : index
    %1 = vector.load %arg4[%c0_1, %c0_2] : memref<16x32xf32, #tpu.memory_space<vmem>>, vector<16x32xf32>
    %c0_3 = arith.constant 0 : index
    %c0_4 = arith.constant 0 : index
    %2 = vector.load %arg5[%c0_3, %c0_4] : memref<1x32xf32, #tpu.memory_space<vmem>>, vector<1x32xf32>
    %c0_5 = arith.constant 0 : index
    %c0_6 = arith.constant 0 : index
    %3 = vector.load %arg1[%c0_5, %c0_6] : memref<8x16xf32, #tpu.memory_space<vmem>>, vector<8x16xf32>
    %cst = arith.constant dense<0.000000e+00> : vector<8x32xf32>
    %4 = tpu.matmul %3, %0, %cst {dimension_numbers = #tpu.dot_dimension_numbers<[1], [0], [0], [1], [0, 0, 1, 1], [], []>} : vector<8x16xf32>, vector<16x32xf32>, vector<8x32xf32> -> vector<8x32xf32>
    %c0_7 = arith.constant 0 : index
    %c0_8 = arith.constant 0 : index
    %5 = vector.load %arg2[%c0_7, %c0_8] : memref<8x16xf32, #tpu.memory_space<vmem>>, vector<8x16xf32>
    %cst_9 = arith.constant dense<0.000000e+00> : vector<8x32xf32>
    %6 = tpu.matmul %5, %1, %cst_9 {dimension_numbers = #tpu.dot_dimension_numbers<[1], [0], [0], [1], [0, 0, 1, 1], [], []>} : vector<8x16xf32>, vector<16x32xf32>, vector<8x32xf32> -> vector<8x32xf32>
    %7 = arith.addf %4, %6 : vector<8x32xf32>
    %8 = vector.broadcast %2 : vector<1x32xf32> to vector<8x32xf32>
    %9 = arith.addf %7, %8 : vector<8x32xf32>
    %cst_10 = arith.constant 0.000000e+00 : f32
    %10 = vector.broadcast %cst_10 : f32 to vector<8x32xf32>
    %11 = arith.maximumf %9, %10 : vector<8x32xf32>
    %c0_11 = arith.constant 0 : index
    %c0_12 = arith.constant 0 : index
    %12 = vector.load %arg6[%c0_11, %c0_12] : memref<32x64xf32, #tpu.memory_space<vmem>>, vector<32x64xf32>
    %c0_13 = arith.constant 0 : index
    %c0_14 = arith.constant 0 : index
    %13 = vector.load %arg7[%c0_13, %c0_14] : memref<1x64xf32, #tpu.memory_space<vmem>>, vector<1x64xf32>
    %cst_15 = arith.constant dense<0.000000e+00> : vector<8x64xf32>
    %14 = tpu.matmul %11, %12, %cst_15 {dimension_numbers = #tpu.dot_dimension_numbers<[1], [0], [0], [1], [0, 0, 1, 1], [], []>} : vector<8x32xf32>, vector<32x64xf32>, vector<8x64xf32> -> vector<8x64xf32>
    %15 = vector.broadcast %13 : vector<1x64xf32> to vector<8x64xf32>
    %16 = arith.addf %14, %15 : vector<8x64xf32>
    %cst_16 = arith.constant 0.000000e+00 : f32
    %17 = vector.broadcast %cst_16 : f32 to vector<8x64xf32>
    %18 = arith.maximumf %16, %17 : vector<8x64xf32>
    %c0_17 = arith.constant 0 : index
    %c0_18 = arith.constant 0 : index
    %19 = vector.load %arg8[%c0_17, %c0_18] : memref<1x64xf32, #tpu.memory_space<vmem>>, vector<1x64xf32>
    %c0_19 = arith.constant 0 : index
    %c0_20 = arith.constant 0 : index
    %20 = vector.load %arg9[%c0_19, %c0_20] : memref<1x1xf32, #tpu.memory_space<vmem>>, vector<1x1xf32>
    %21 = vector.broadcast %19 : vector<1x64xf32> to vector<8x64xf32>
    %22 = arith.mulf %18, %21 : vector<8x64xf32>
    %cst_21 = arith.constant dense<0.000000e+00> : vector<8xf32>
    %23 = vector.multi_reduction <add>, %22, %cst_21 [1] : vector<8x64xf32> to vector<8xf32>
    %24 = vector.shape_cast %23 : vector<8xf32> to vector<8x1xf32>
    %25 = vector.broadcast %20 : vector<1x1xf32> to vector<8x1xf32>
    %26 = arith.addf %24, %25 : vector<8x1xf32>
    %27 = tpu.transpose %26, [1, 0] : vector<8x1xf32> -> vector<1x8xf32>
    %c0_22 = arith.constant 0 : index
    %c0_23 = arith.constant 0 : index
    %28 = vector.load %arg10[%c0_22, %c0_23] : memref<1x8xf32, #tpu.memory_space<vmem>>, vector<1x8xf32>
    tpu.vector_store %arg10[%c0_22, %c0_23], %27 {strides = array<i32>} : memref<1x8xf32, #tpu.memory_space<vmem>>, vector<1x8xf32>,
    return
  }
  func.func @transform_0(%arg0: i32) -> (i32, i32) {
    %c0_i32 = arith.constant 0 : i32
    %c0_i32_0 = arith.constant 0 : i32
    return %arg0, %c0_i32 : i32, i32
  }
  func.func @transform_1(%arg0: i32) -> (i32, i32) {
    %c0_i32 = arith.constant 0 : i32
    %c0_i32_0 = arith.constant 0 : i32
    return %arg0, %c0_i32 : i32, i32
  }
  func.func @transform_2(%arg0: i32) -> (i32, i32) {
    %c0_i32 = arith.constant 0 : i32
    %c0_i32_0 = arith.constant 0 : i32
    %c0_i32_1 = arith.constant 0 : i32
    return %c0_i32, %c0_i32_0 : i32, i32
  }
  func.func @transform_3(%arg0: i32) -> (i32, i32) {
    %c0_i32 = arith.constant 0 : i32
    %c0_i32_0 = arith.constant 0 : i32
    %c0_i32_1 = arith.constant 0 : i32
    return %c0_i32, %c0_i32_0 : i32, i32
  }
  func.func @transform_4(%arg0: i32) -> (i32, i32) {
    %c0_i32 = arith.constant 0 : i32
    %c0_i32_0 = arith.constant 0 : i32
    %c0_i32_1 = arith.constant 0 : i32
    return %c0_i32, %c0_i32_0 : i32, i32
  }
  func.func @transform_5(%arg0: i32) -> (i32, i32) {
    %c0_i32 = arith.constant 0 : i32
    %c0_i32_0 = arith.constant 0 : i32
    %c0_i32_1 = arith.constant 0 : i32
    return %c0_i32, %c0_i32_0 : i32, i32
  }
  func.func @transform_6(%arg0: i32) -> (i32, i32) {
    %c0_i32 = arith.constant 0 : i32
    %c0_i32_0 = arith.constant 0 : i32
    %c0_i32_1 = arith.constant 0 : i32
    return %c0_i32, %c0_i32_0 : i32, i32
  }
  func.func @transform_7(%arg0: i32) -> (i32, i32) {
    %c0_i32 = arith.constant 0 : i32
    %c0_i32_0 = arith.constant 0 : i32
    %c0_i32_1 = arith.constant 0 : i32
    return %c0_i32, %c0_i32_0 : i32, i32
  }
  func.func @transform_8(%arg0: i32) -> (i32, i32) {
    %c0_i32 = arith.constant 0 : i32
    %c0_i32_0 = arith.constant 0 : i32
    %c0_i32_1 = arith.constant 0 : i32
    return %c0_i32, %c0_i32_0 : i32, i32
  }
  func.func @transform_9(%arg0: i32) -> (i32, i32) {
    %c0_i32 = arith.constant 0 : i32
    %c0_i32_0 = arith.constant 0 : i32
    return %arg0, %c0_i32 : i32, i32
  }
}

</mosaic_0001>

<bundles_post_ra>
// kernel: link_weight_decoder_forward.1
= control target key start
LH: loop header
LB: loop body
LE: loop exit
PB: predicated region body
PF: predicated region fallthrough
CT: control target
= control target key end

     0   :  { %s322_s0 = inlined_call_operand.vmem [shape: f32[8,16], index: 0, kind: input, shape index: {}]   ;;  %s323_s1 = inlined_call_operand.vmem [shape: f32[8,16], index: 1, kind: input, shape index: {}]   ;;  %s324_s2 = inlined_call_operand.vmem [shape: f32[16,32], index: 2, kind: input, shape index: {}]   ;;  %s325_s3 = inlined_call_operand.vmem [shape: f32[16,32], index: 3, kind: input, shape index: {}]   ;;  %s326_s4 = inlined_call_operand.vmem [shape: f32[1,32], index: 4, kind: input, shape index: {}]   ;;  %s327_s5 = inlined_call_operand.vmem [shape: f32[32,64], index: 5, kind: input, shape index: {}]   ;;  %s328_s6 = inlined_call_operand.vmem [shape: f32[1,64], index: 6, kind: input, shape index: {}]   ;;  %s329_s7 = inlined_call_operand.vmem [shape: f32[1,64], index: 7, kind: input, shape index: {}]   ;;  %s330_s8 = inlined_call_operand.<no memory space> [shape: f32[1,1], index: 8, kind: input, shape index: {}]   ;;  %s331_s9 = inlined_call_operand.hbm [shape: f32[1,8], index: 9, kind: output, shape index: {}]  }
   0x1   :  { %v14_v0 = vstv %s330_s8 }
   0x2   :  { %15 = vst [vmem:[#allocation2] sm:$0x1] %v14_v0 }
   0x3   :  { %v38_v1 = vld [vmem:[%s325_s3 + $0x8] sm:$0xff]  ;;  %v37_v3 = vld [vmem:[%s325_s3] sm:$0xff]  ;;  %vm42_vm0 = vcmask 130048  }
   0x4   :  { %v36_v2 = vld [vmem:[%s324_s2 + $0x8] sm:$0xff]  ;;  %60 = vmatpush.msra.mxu0 %v38_v1  ;;  %v35_v4 = vld [vmem:[%s324_s2] sm:$0xff] }
   0x5   :  { %83 = vmatpush.msra.mxu1 %v36_v2  ;;  %v41_v5 = vld [vmem:[%s323_s1] sm:$0xff] }
   0x6   :  { %v40_v6 = vld [vmem:[%s322_s0] sm:$0xff]  ;;  %61 = vmatpush.msra.mxu0 %v37_v3 }
   0x7   :  { %84 = vmatpush.msra.mxu1 %v35_v4 }
   0x8   :  { %16 = vsyncpa [#allocation4], 0  ;;  %191 = vmatmul.msk.f32.vlgmr.msra.gmra.mxu0 %vm42_vm0, %v41_v5  ;;  %192 = vmatmul.msk.f32.vlgmr.msra.gmra.mxu1 %vm42_vm0, %v40_v6  ;;  %v97_v7 = vld [vmem:[%s327_s5 + $0x18] sm:$0xff]  ;;  %v96_v8 = vld [vmem:[%s327_s5 + $0x10] sm:$0xff]  ;;  %vm102_vm1 = vcmask 261120   ;;  %vm133_vm2 = vcmask 523264  }
   0x9   :  { %118 = vmatpush.msra.mxu2 %v97_v7  ;;  %v95_v9 = vld [vmem:[%s327_s5 + $0x8] sm:$0xff]  ;;  %v94_v10 = vld [vmem:[%s327_s5] sm:$0xff]  ;;  %vm173_vm3 = vcmask 57344  }
   0xa   :  { %v196_v11 = vld [vmem:[%s326_s4] ss:$0 sm:$0xff]  ;;  %s226_s4 = smov [#allocation3]  }
   0xb   :  { %119 = vmatpush.msra.mxu2 %v96_v8  ;;  %v197_v17 = vld [vmem:[%s328_s6] ss:$0 sm:$0xff]  ;;  %s180_s10 = sshll.u32 %s226_s4, 4  ;;  %s182_s6 = sshll.u32 %s331_s9, 4  ;;  %s181_s10 = int_to_ptr.vmem [resolvable:$true] %s180_s10  ;;  %s183_s6 = int_to_ptr.hbm [resolvable:$true] %s182_s6 }
   0xc   :  { %v198_v20 = vld [vmem:[%s329_s7] ss:$0 sm:$0xff] }
   0xd   :  { %120 = vmatpush.msra.mxu2 %v95_v9  ;;  %v199_v24 = vld [vmem:[#allocation2] ss:$0 sm:$0xff] }
   0xf   :  { %121 = vmatpush.msra.mxu2 %v94_v10 }
  0x85   :  { %v63_v12 = vpop.f32.mrf.mxu0  ;;  %v86_v13 = vpop.f32.mrf.mxu1 }
  0x86   :  { %v87_v14 = vadd.f32 %v86_v13, %v63_v12 }
  0x88   :  { %v92_v15 = vadd.f32 %v196_v11, %v87_v14 }
  0x8a   :  { %v93_v16 = vmax.f32 %v92_v15, 0.0 }
  0x8c   :  { %193 = vmatmul.msk.f32.vlgmr.msra.gmra.mxu2 %vm102_vm1, %v93_v16 }
 0x10f   :  { %v123_v18 = vpop.f32.mrf.mxu2 }
 0x110   :  { %v124_v19 = vadd.f32 %v197_v17, %v123_v18 }
 0x112   :  { %v126_v21 = vmax.f32 %v124_v19, 0.0 }
 0x114   :  { %v132_v22 = vmul.f32 %v198_v20, %v126_v21 }
 0x116   :  { %v134_v23 = vsel %vm133_vm2, %v132_v22, 0.0 }
 0x117   :  { %135 = vadd.xlane.f32.xlu0 %v134_v23 }
 0x18a   :  { %v136_v25 = vpop.xlane.xlu0 %135 }
 0x18b   :  { %v140_v26 = vadd.f32 %v199_v24, %v136_v25 }
 0x18d   :  { %141 = vxpose.xlu0.b32.start.end [1/1] (short) (narrow) %v140_v26, 8 }
 0x231   :  { %v157_v27 = vpop.trf.xlu0 }
 0x232   :  { %174 = vst.msk [vmem:[#allocation3] sm:$0x1] %vm173_vm3, %v157_v27 }
 0x233   :  { %185 = dma.vmem_to_hbm [thread:$0]  %s181_s10, 16, %s183_s6, [#allocation4]  }
 0x234   :  { %224 = dma.done.wait [#allocation4], 16  }
 0x235   :  { %225 = vsyncadd [#allocation4], 4294967280 }
 0x236   :  { %190 = vsyncpa [#allocation4], 1 }

</bundles_post_ra>
